<compile_context>
chip_gen: v7x
topology: tpu7x:2x2x1
jax: 0.10.0
libtpu: 0.0.40
codegen_flags: <defaults>
</compile_context>

<pallas_src>
import functools
import math

import jax
import jax.numpy as jnp
from jax import lax
from jax.experimental import pallas as pl
from jax.experimental.pallas import tpu as pltpu


_VMEM_LIMIT = 64 * 1024 * 1024          # scoped-VMEM budget (<= v7x physical VMEM)
_Q_TILE_CAP = 256                       # attention query-tile cap
_KV_TILE_CAP = 256                      # attention kv-tile cap
_PROJ_TILE_CAP = 512                    # projection M/N tile cap


def _round_up(x, m):
    return ((x + m - 1) // m) * m


def _proj_tile(n, cap=_PROJ_TILE_CAP):
    """Row/col tile for projection kernels; partial last blocks are fine."""
    return n if n <= cap else cap


# ----------------------------------------------------------------------------
# Pallas kernels
# ----------------------------------------------------------------------------
def _fused_kv_kernel(enc_ref, wk_ref, wv_ref, kd_ref, ku_ref, vd_ref, vu_ref,
                     k_out_ref, v_out_ref):
    """key = enc@Wk + (enc@Kdown)@Kup ; value = enc@Wv + (enc@Vdown)@Vup."""
    enc = enc_ref[...]

    k_acc = jnp.dot(enc, wk_ref[...], preferred_element_type=jnp.float32)
    k_low = jnp.dot(enc, kd_ref[...], preferred_element_type=jnp.float32)
    k_acc += jnp.dot(k_low.astype(ku_ref.dtype), ku_ref[...],
                     preferred_element_type=jnp.float32)
    k_out_ref[...] = k_acc.astype(k_out_ref.dtype)

    v_acc = jnp.dot(enc, wv_ref[...], preferred_element_type=jnp.float32)
    v_low = jnp.dot(enc, vd_ref[...], preferred_element_type=jnp.float32)
    v_acc += jnp.dot(v_low.astype(vu_ref.dtype), vu_ref[...],
                     preferred_element_type=jnp.float32)
    v_out_ref[...] = v_acc.astype(v_out_ref.dtype)


def _fused_kv_rel_kernel(enc_ref, rel_ref, wk_ref, wv_ref, kd_ref, ku_ref,
                         vd_ref, vu_ref, k_out_ref, v_out_ref):
    """Same as above with relation_embs folded in:
       enc@Wk + rel@Wk == (enc+rel)@Wk (linearity); LoRA applies to enc only."""
    enc = enc_ref[...]
    base_in = enc + rel_ref[...]

    k_acc = jnp.dot(base_in, wk_ref[...], preferred_element_type=jnp.float32)
    k_low = jnp.dot(enc, kd_ref[...], preferred_element_type=jnp.float32)
    k_acc += jnp.dot(k_low.astype(ku_ref.dtype), ku_ref[...],
                     preferred_element_type=jnp.float32)
    k_out_ref[...] = k_acc.astype(k_out_ref.dtype)

    v_acc = jnp.dot(base_in, wv_ref[...], preferred_element_type=jnp.float32)
    v_low = jnp.dot(enc, vd_ref[...], preferred_element_type=jnp.float32)
    v_acc += jnp.dot(v_low.astype(vu_ref.dtype), vu_ref[...],
                     preferred_element_type=jnp.float32)
    v_out_ref[...] = v_acc.astype(v_out_ref.dtype)


def _fused_out_kernel(hs_ref, wo_ref, bo_ref, od_ref, ou_ref, o_ref):
    """out = hs@Wo + bo + (hs@OutDown)@OutUp."""
    hs = hs_ref[...]
    acc = jnp.dot(hs, wo_ref[...], preferred_element_type=jnp.float32)
    acc += bo_ref[...]                                   # (1, tn) broadcast, f32
    low = jnp.dot(hs, od_ref[...], preferred_element_type=jnp.float32)
    acc += jnp.dot(low.astype(ou_ref.dtype), ou_ref[...],
                   preferred_element_type=jnp.float32)
    o_ref[...] = acc.astype(o_ref.dtype)


def _attention_kernel(hs_ref, wq_ref, k_ref, v_ref, o_ref,
                      q_scr, m_scr, l_scr, acc_scr,
                      *, heads, dim_head, kv_len, kv_tile):
    """Flash-style cross attention, all heads of one (batch, q-tile) per grid step.

    Q projection (scale pre-folded into Wq) is computed once per q-tile at
    kv_step==0 into a (H, tq, Dh) VMEM scratch; K/V tiles are relayouted once per
    step to (H, tkv, Dh) and both matmuls run head-batched on the MXU.  Softmax
    statistics are f32.  Padded KV columns (when Skv was padded to a tile multiple)
    are masked with -1e30 before the softmax.
    """
    H, Dh = heads, dim_head
    kv_step = pl.program_id(2)

    @pl.when(kv_step == 0)
    def _init():
        # Fused scaled Q projection: (tq, Dq) @ (Dq, H*Dh) -> (tq, H*Dh), f32 acc.
        q = jnp.dot(hs_ref[0], wq_ref[...], preferred_element_type=jnp.float32)
        tq = q.shape[0]
        # One relayout per q-tile into head-major (H, tq, Dh).
        q_scr[...] = q.reshape(tq, H, Dh).transpose(1, 0, 2).astype(q_scr.dtype)
        m_scr[...] = jnp.full(m_scr.shape, -jnp.inf, m_scr.dtype)
        l_scr[...] = jnp.zeros(l_scr.shape, l_scr.dtype)
        acc_scr[...] = jnp.zeros(acc_scr.shape, acc_scr.dtype)

    k_blk = k_ref[0]                                     # (tkv, H*Dh)
    v_blk = v_ref[0]
    tkv = k_blk.shape[0]
    k = k_blk.reshape(tkv, H, Dh).transpose(1, 0, 2)     # (H, tkv, Dh)
    v = v_blk.reshape(tkv, H, Dh).transpose(1, 0, 2)     # (H, tkv, Dh)
    q = q_scr[...]                                       # (H, tq,  Dh)

    # Head-batched QK^T (contract Dh, batch over H): (H, tq, tkv) f32.
    s = lax.dot_general(q, k, (((2,), (2,)), ((0,), (0,))),
                        preferred_element_type=jnp.float32)

    if kv_len % kv_tile != 0:  # static: Skv was padded -> mask padded columns
        col = kv_step * kv_tile + lax.broadcasted_iota(jnp.int32, s.shape, 2)
        s = jnp.where(col < kv_len, s, -1e30)

    m_prev = m_scr[...]                                  # (H, tq, 1) f32
    m_new = jnp.maximum(m_prev, jnp.max(s, axis=-1, keepdims=True))
    alpha = jnp.exp(m_prev - m_new)
    p = jnp.exp(s - m_new)                               # (H, tq, tkv) f32
    l_scr[...] = alpha * l_scr[...] + jnp.sum(p, axis=-1, keepdims=True)
    # Head-batched P@V: (H, tq, Dh) f32.
    pv = lax.dot_general(p.astype(v.dtype), v, (((2,), (1,)), ((0,), (0,))),
                         preferred_element_type=jnp.float32)
    acc_scr[...] = alpha * acc_scr[...] + pv
    m_scr[...] = m_new

    @pl.when(kv_step == pl.num_programs(2) - 1)
    def _finalize():
        inv_l = pl.reciprocal(l_scr[...], approx=True)   # EUP slot
        out = acc_scr[...] * inv_l                       # (H, tq, Dh) f32
        tq = out.shape[1]
        # Single lane-dense store: (H, tq, Dh) -> (tq, H*Dh).
        o_ref[0] = out.transpose(1, 0, 2).reshape(tq, H * Dh).astype(o_ref.dtype)


# ----------------------------------------------------------------------------
# Wrappers
# ----------------------------------------------------------------------------
def pallas_fused_kv(enc, wk, wv, kd, ku, vd, vu, rel=None, *, out_dtype=None):
    """Fused key/value projections: base + LoRA (+ optional relation_embs)."""
    lead, K = enc.shape[:-1], enc.shape[-1]
    M = math.prod(lead)
    N = wk.shape[1]
    R = kd.shape[1]
    out_dtype = out_dtype or enc.dtype
    enc2 = enc.reshape(M, K)
    tm = _proj_tile(M)
    tn = _proj_tile(N)

    weight_specs = [
        pl.BlockSpec((K, tn), lambda i, j: (0, j)),   # wk
        pl.BlockSpec((K, tn), lambda i, j: (0, j)),   # wv
        pl.BlockSpec((K, R), lambda i, j: (0, 0)),    # k_down (full rank, resident)
        pl.BlockSpec((R, tn), lambda i, j: (0, j)),   # k_up
        pl.BlockSpec((K, R), lambda i, j: (0, 0)),    # v_down
        pl.BlockSpec((R, tn), lambda i, j: (0, j)),   # v_up
    ]
    out_specs = (pl.BlockSpec((tm, tn), lambda i, j: (i, j)),
                 pl.BlockSpec((tm, tn), lambda i, j: (i, j)))
    out_shape = (jax.ShapeDtypeStruct((M, N), out_dtype),
                 jax.ShapeDtypeStruct((M, N), out_dtype))
    grid = (pl.cdiv(M, tm), pl.cdiv(N, tn))
    n_enc_reads = 1 if rel is None else 2
    ce = pl.CostEstimate(
        flops=int(2 * M * K * (2 * N + 2 * R) + 2 * M * R * 2 * N),
        transcendentals=0,
        bytes_accessed=int((n_enc_reads * M * K + 2 * K * N + 2 * K * R
                            + 2 * R * N + 2 * M * N) * enc.dtype.itemsize))
    cp = pltpu.CompilerParams(dimension_semantics=("parallel", "parallel"),
                              vmem_limit_bytes=_VMEM_LIMIT)

    if rel is None:
        k_out, v_out = pl.pallas_call(
            _fused_kv_kernel,
            out_shape=out_shape,
            grid=grid,
            in_specs=[pl.BlockSpec((tm, K), lambda i, j: (i, 0))] + weight_specs,
            out_specs=out_specs,
            compiler_params=cp,
            cost_estimate=ce,
        )(enc2, wk, wv, kd, ku, vd, vu)
    else:
        rel2 = rel.reshape(M, K)
        k_out, v_out = pl.pallas_call(
            _fused_kv_rel_kernel,
            out_shape=out_shape,
            grid=grid,
            in_specs=[pl.BlockSpec((tm, K), lambda i, j: (i, 0)),
                      pl.BlockSpec((tm, K), lambda i, j: (i, 0))] + weight_specs,
            out_specs=out_specs,
            compiler_params=cp,
            cost_estimate=ce,
        )(enc2, rel2, wk, wv, kd, ku, vd, vu)
    return k_out.reshape(*lead, N), v_out.reshape(*lead, N)


def pallas_fused_out(hs, wo, bo, od, ou, *, out_dtype=None):
    """Fused output projection: hs@Wo + bo + (hs@OutDown)@OutUp."""
    lead, K = hs.shape[:-1], hs.shape[-1]
    M = math.prod(lead)
    N = wo.shape[1]
    R = od.shape[1]
    out_dtype = out_dtype or hs.dtype
    hs2 = hs.reshape(M, K)
    tm = _proj_tile(M)
    tn = _proj_tile(N)
    out = pl.pallas_call(
        _fused_out_kernel,
        out_shape=jax.ShapeDtypeStruct((M, N), out_dtype),
        grid=(pl.cdiv(M, tm), pl.cdiv(N, tn)),
        in_specs=[pl.BlockSpec((tm, K), lambda i, j: (i, 0)),
                  pl.BlockSpec((K, tn), lambda i, j: (0, j)),
                  pl.BlockSpec((1, tn), lambda i, j: (0, j)),
                  pl.BlockSpec((K, R), lambda i, j: (0, 0)),
                  pl.BlockSpec((R, tn), lambda i, j: (0, j))],
        out_specs=pl.BlockSpec((tm, tn), lambda i, j: (i, j)),
        compiler_params=pltpu.CompilerParams(
            dimension_semantics=("parallel", "parallel"),
            vmem_limit_bytes=_VMEM_LIMIT),
        cost_estimate=pl.CostEstimate(
            flops=int(2 * M * K * N + 2 * M * K * R + 2 * M * R * N),
            transcendentals=0,
            bytes_accessed=int((M * K + K * N + N + K * R + R * N + M * N)
                               * hs.dtype.itemsize)),
    )(hs2, wo, bo.reshape(1, N).astype(jnp.float32), od, ou)
    return out.reshape(*lead, N)


def pallas_attention(hs, wq_scaled, k, v, *, heads, dim_head, out_dtype=None):
    """hs: (B, Sq, Dq), wq_scaled: (Dq, H*Dh), k/v: (B, Skv, H*Dh) -> (B, Sq, H*Dh).

    Q projection fused (scale pre-folded into Wq).  Sq/Skv are padded to tile
    multiples; padded KV columns masked inside the kernel, padded Q rows sliced off.
    """
    B, Sq, Dq = hs.shape
    Skv = k.shape[1]
    D = heads * dim_head
    assert k.shape[-1] == D and v.shape[-1] == D and wq_scaled.shape == (Dq, D)
    out_dtype = out_dtype or hs.dtype

    tq = min(_Q_TILE_CAP, _round_up(Sq, 8))
    sq_pad = _round_up(Sq, tq)
    tkv = min(_KV_TILE_CAP, _round_up(Skv, 8))
    skv_pad = _round_up(Skv, tkv)

    if sq_pad != Sq:
        hs = jnp.pad(hs, ((0, 0), (0, sq_pad - Sq), (0, 0)))
    if skv_pad != Skv:
        k = jnp.pad(k, ((0, 0), (0, skv_pad - Skv), (0, 0)))
        v = jnp.pad(v, ((0, 0), (0, skv_pad - Skv), (0, 0)))

    kern = functools.partial(_attention_kernel, heads=heads, dim_head=dim_head,
                             kv_len=Skv, kv_tile=tkv)
    ce = pl.CostEstimate(
        flops=int(2 * B * sq_pad * Dq * D                          # fused Q proj
                  + 4 * B * heads * sq_pad * skv_pad * dim_head),  # QK^T + PV
        transcendentals=int(B * heads * sq_pad * skv_pad),         # exp per score
        bytes_accessed=int((B * sq_pad * Dq + Dq * D + 2 * B * skv_pad * D
                            + B * sq_pad * D) * hs.dtype.itemsize))

    out = pl.pallas_call(
        kern,
        out_shape=jax.ShapeDtypeStruct((B, sq_pad, D), out_dtype),
        grid=(B, sq_pad // tq, skv_pad // tkv),
        in_specs=[pl.BlockSpec((1, tq, Dq), lambda b, qi, ki: (b, qi, 0)),   # hs tile
                  pl.BlockSpec((Dq, D), lambda b, qi, ki: (0, 0)),           # Wq (resident)
                  pl.BlockSpec((1, tkv, D), lambda b, qi, ki: (b, ki, 0)),   # K tile
                  pl.BlockSpec((1, tkv, D), lambda b, qi, ki: (b, ki, 0))],  # V tile
        out_specs=pl.BlockSpec((1, tq, D), lambda b, qi, ki: (b, qi, 0)),
        scratch_shapes=[pltpu.VMEM((heads, tq, dim_head), hs.dtype),         # q (head-major)
                        pltpu.VMEM((heads, tq, 1), jnp.float32),             # m
                        pltpu.VMEM((heads, tq, 1), jnp.float32),             # l
                        pltpu.VMEM((heads, tq, dim_head), jnp.float32)],     # acc
        compiler_params=pltpu.CompilerParams(
            dimension_semantics=("parallel", "parallel", "arbitrary"),
            vmem_limit_bytes=_VMEM_LIMIT),
        cost_estimate=ce,
    )(hs, wq_scaled, k, v)

    if sq_pad != Sq:
        out = out[:, :Sq]
    return out


# ----------------------------------------------------------------------------
# TunedCrossAttention forward (Pallas-backed)
# ----------------------------------------------------------------------------
def tuned_cross_attention(params, hidden_states, encoder_hidden_states,
                          relation_embs=None, *, heads, dim_head,
                          compute_dtype=jnp.bfloat16):
    """bf16 matmul operands by default (f32 accumulation / f32 softmax stats)."""
    out_dtype = hidden_states.dtype
    scale = dim_head ** (-0.5)

    cast = lambda t: t.astype(compute_dtype)
    hs = cast(hidden_states)
    enc = cast(encoder_hidden_states)
    rel = cast(relation_embs) if relation_embs is not None else None

    # Fold softmax scale into the Q projection weight (zero runtime cost).
    wq_scaled = cast(params["wq_t"] * scale)

    key, value = pallas_fused_kv(
        enc, cast(params["wk_t"]), cast(params["wv_t"]),
        cast(params["add_k_down_t"]), cast(params["add_k_up_t"]),
        cast(params["add_v_down_t"]), cast(params["add_v_up_t"]),
        rel=rel, out_dtype=compute_dtype)                              # (B, Skv, inner)

    # Q projection fused into the attention kernel (no HBM round trip for Q).
    attn = pallas_attention(hs, wq_scaled, key, value, heads=heads,
                            dim_head=dim_head, out_dtype=compute_dtype)  # (B, Sq, inner)

    out = pallas_fused_out(attn, cast(params["wo_t"]), params["bo"],
                           cast(params["add_out_down_t"]),
                           cast(params["add_out_up_t"]),
                           out_dtype=out_dtype)
    # to_out[1] is Dropout(p=0) -> identity.
    return out


# ----------------------------------------------------------------------------
# Deterministic parameter construction (shapes per the module's __init__)
# ----------------------------------------------------------------------------
def make_params(key, query_dim, cross_dim, heads, dim_head, rank):
    inner = heads * dim_head
    ks = jax.random.split(key, 12)
    n = jax.random.normal
    # NOTE: the PyTorch module inits LoRA `up` to zeros; we use small nonzero
    # deterministic values so the LoRA compute path is actually exercised.
    return {
        "wq_t": n(ks[0], (query_dim, inner), jnp.float32) * 0.05,
        "wk_t": n(ks[1], (cross_dim, inner), jnp.float32) * 0.05,
        "wv_t": n(ks[2], (cross_dim, inner), jnp.float32) * 0.05,
        "wo_t": n(ks[3], (inner, query_dim), jnp.float32) * 0.05,
        "bo": n(ks[4], (query_dim,), jnp.float32) * 0.05,
        "add_k_down_t": n(ks[5], (cross_dim, rank), jnp.float32) * (1.0 / rank),
        "add_k_up_t": n(ks[6], (rank, inner), jnp.float32) * 0.02,
        "add_v_down_t": n(ks[7], (cross_dim, rank), jnp.float32) * (1.0 / rank),
        "add_v_up_t": n(ks[8], (rank, inner), jnp.float32) * 0.02,
        "add_out_down_t": n(ks[9], (inner, rank), jnp.float32) * (1.0 / rank),
        "add_out_up_t": n(ks[10], (rank, query_dim), jnp.float32) * 0.02,
    }


def reference_forward(params, hs, enc, rel=None, *, heads, dim_head):
    """Pure-JAX reference (incl. relation_embs path) for verification."""
    H = heads
    scale = dim_head ** (-0.5)
    q = hs @ params["wq_t"]
    k = enc @ params["wk_t"] + (enc @ params["add_k_down_t"]) @ params["add_k_up_t"]
    v = enc @ params["wv_t"] + (enc @ params["add_v_down_t"]) @ params["add_v_up_t"]
    if rel is not None:
        k = k + rel @ params["wk_t"]
        v = v + rel @ params["wv_t"]

    def split(t):
        b, s, d = t.shape
        return t.reshape(b, s, H, d // H).transpose(0, 2, 1, 3)

    qh, kh, vh = split(q), split(k), split(v)                   # (B, H, S, Dh)
    s = jnp.einsum("bhqd,bhkd->bhqk", qh, kh) * scale
    p = jax.nn.softmax(s, axis=-1)
    o = jnp.einsum("bhqk,bhkd->bhqd", p, vh)
    b, h, sq, dh = o.shape
    o = o.transpose(0, 2, 1, 3).reshape(b, sq, h * dh)
    return (o @ params["wo_t"] + params["bo"]
            + (o @ params["add_out_down_t"]) @ params["add_out_up_t"])


if __name__ == "__main__":
    # Small, module-consistent shapes.
    B, Sq, Skv = 2, 16, 8
    query_dim, cross_dim = 64, 128
    heads, dim_head, rank = 4, 32, 32       # inner_dim = 128, rank <= min(in, out)

    key = jax.random.PRNGKey(0)
    k_p, k_h, k_e, k_r, k_h2, k_e2 = jax.random.split(key, 6)
    params = make_params(k_p, query_dim, cross_dim, heads, dim_head, rank)

    hidden_states = jax.random.normal(k_h, (B, Sq, query_dim), jnp.float32)
    encoder_hidden_states = jax.random.normal(k_e, (B, Skv, cross_dim), jnp.float32)
    relation_embs = jax.random.normal(k_r, (B, Skv, cross_dim), jnp.float32)

    # --- f32 path, no relation_embs ---
    out = tuned_cross_attention(params, hidden_states, encoder_hidden_states,
                                relation_embs=None, heads=heads, dim_head=dim_head,
                                compute_dtype=jnp.float32)
    out = jax.block_until_ready(out)
    ref = reference_forward(params, hidden_states, encoder_hidden_states, None,
                            heads=heads, dim_head=dim_head)
    assert out.shape == (B, Sq, query_dim)
    assert jnp.allclose(out, ref, atol=5e-3, rtol=5e-3), "f32 mismatch vs reference"

    # --- f32 path with relation_embs (exercises the fused rel K/V kernel) ---
    out_rel = jax.block_until_ready(tuned_cross_attention(
        params, hidden_states, encoder_hidden_states, relation_embs=relation_embs,
        heads=heads, dim_head=dim_head, compute_dtype=jnp.float32))
    ref_rel = reference_forward(params, hidden_states, encoder_hidden_states,
                                relation_embs, heads=heads, dim_head=dim_head)
    assert jnp.allclose(out_rel, ref_rel, atol=5e-3, rtol=5e-3), "relation_embs mismatch"

    # --- default bf16 fast path (bf16 matmul operands, f32 accumulation / stats) ---
    out_bf16 = jax.block_until_ready(tuned_cross_attention(
        params, hidden_states, encoder_hidden_states, relation_embs=None,
        heads=heads, dim_head=dim_head))
    assert out_bf16.dtype == jnp.float32
    assert jnp.allclose(out_bf16, ref, atol=7e-2, rtol=7e-2), "bf16 mismatch vs reference"

    # --- ragged Sq / Skv (exercises the pad + in-kernel KV masking path) ---
    Sq2, Skv2 = 10, 13
    hs2 = jax.random.normal(k_h2, (B, Sq2, query_dim), jnp.float32)
    enc2 = jax.random.normal(k_e2, (B, Skv2, cross_dim), jnp.float32)
    out_rag = jax.block_until_ready(tuned_cross_attention(
        params, hs2, enc2, relation_embs=None, heads=heads, dim_head=dim_head,
        compute_dtype=jnp.float32))
    ref_rag = reference_forward(params, hs2, enc2, None,
                                heads=heads, dim_head=dim_head)
    assert out_rag.shape == (B, Sq2, query_dim)
    assert jnp.allclose(out_rag, ref_rag, atol=5e-3, rtol=5e-3), "ragged mismatch"

    print("KERNEL_OK")
</pallas_src>

<mosaic_0001>
module attributes {stable_mosaic.version = 11 : i64} {
  func.func @_fused_kv_kernel(%arg0: i32, %arg1: i32, %arg2: memref<16x128xf32, #tpu.memory_space<vmem>>, %arg3: memref<128x128xf32, #tpu.memory_space<vmem>>, %arg4: memref<128x128xf32, #tpu.memory_space<vmem>>, %arg5: memref<128x32xf32, #tpu.memory_space<vmem>>, %arg6: memref<32x128xf32, #tpu.memory_space<vmem>>, %arg7: memref<128x32xf32, #tpu.memory_space<vmem>>, %arg8: memref<32x128xf32, #tpu.memory_space<vmem>>, %arg9: memref<16x128xf32, #tpu.memory_space<vmem>>, %arg10: memref<16x128xf32, #tpu.memory_space<vmem>>) attributes {dimension_semantics = [#tpu.dimension_semantics<parallel>, #tpu.dimension_semantics<parallel>], iteration_bounds = array<i64: 1, 1>, scalar_prefetch = 0 : i64, scratch_operands = 0 : i64, tpu.core_type = #tpu.core_type<tc>, window_params = [{transform_indices = @transform_0, window_bounds = array<i64: 16, 128>}, {transform_indices = @transform_1, window_bounds = array<i64: 128, 128>}, {transform_indices = @transform_2, window_bounds = array<i64: 128, 128>}, {pipeline_mode = #tpu.pipeline_mode<synchronous>, transform_indices = @transform_3, window_bounds = array<i64: 128, 32>}, {transform_indices = @transform_4, window_bounds = array<i64: 32, 128>}, {pipeline_mode = #tpu.pipeline_mode<synchronous>, transform_indices = @transform_5, window_bounds = array<i64: 128, 32>}, {transform_indices = @transform_6, window_bounds = array<i64: 32, 128>}, {transform_indices = @transform_7, window_bounds = array<i64: 16, 128>}, {transform_indices = @transform_8, window_bounds = array<i64: 16, 128>}]} {
    %c0 = arith.constant 0 : index
    %c0_0 = arith.constant 0 : index
    %0 = vector.load %arg2[%c0, %c0_0] : memref<16x128xf32, #tpu.memory_space<vmem>>, vector<16x128xf32>
    %c0_1 = arith.constant 0 : index
    %c0_2 = arith.constant 0 : index
    %1 = vector.load %arg3[%c0_1, %c0_2] : memref<128x128xf32, #tpu.memory_space<vmem>>, vector<128x128xf32>
    %cst = arith.constant dense<0.000000e+00> : vector<16x128xf32>
    %2 = tpu.matmul %0, %1, %cst {dimension_numbers = #tpu.dot_dimension_numbers<[1], [0], [0], [1], [0, 0, 1, 1], [], []>} : vector<16x128xf32>, vector<128x128xf32>, vector<16x128xf32> -> vector<16x128xf32>
    %c0_3 = arith.constant 0 : index
    %c0_4 = arith.constant 0 : index
    %3 = vector.load %arg5[%c0_3, %c0_4] : memref<128x32xf32, #tpu.memory_space<vmem>>, vector<128x32xf32>
    %cst_5 = arith.constant dense<0.000000e+00> : vector<16x32xf32>
    %4 = tpu.matmul %0, %3, %cst_5 {dimension_numbers = #tpu.dot_dimension_numbers<[1], [0], [0], [1], [0, 0, 1, 1], [], []>} : vector<16x128xf32>, vector<128x32xf32>, vector<16x32xf32> -> vector<16x32xf32>
    %c0_6 = arith.constant 0 : index
    %c0_7 = arith.constant 0 : index
    %5 = vector.load %arg6[%c0_6, %c0_7] : memref<32x128xf32, #tpu.memory_space<vmem>>, vector<32x128xf32>
    %cst_8 = arith.constant dense<0.000000e+00> : vector<16x128xf32>
    %6 = tpu.matmul %4, %5, %cst_8 {dimension_numbers = #tpu.dot_dimension_numbers<[1], [0], [0], [1], [0, 0, 1, 1], [], []>} : vector<16x32xf32>, vector<32x128xf32>, vector<16x128xf32> -> vector<16x128xf32>
    %7 = arith.addf %2, %6 : vector<16x128xf32>
    %c0_9 = arith.constant 0 : index
    %c0_10 = arith.constant 0 : index
    %8 = vector.load %arg9[%c0_9, %c0_10] : memref<16x128xf32, #tpu.memory_space<vmem>>, vector<16x128xf32>
    tpu.vector_store %arg9[%c0_9, %c0_10], %7 {strides = array<i32>} : memref<16x128xf32, #tpu.memory_space<vmem>>, vector<16x128xf32>,
    %c0_11 = arith.constant 0 : index
    %c0_12 = arith.constant 0 : index
    %9 = vector.load %arg4[%c0_11, %c0_12] : memref<128x128xf32, #tpu.memory_space<vmem>>, vector<128x128xf32>
    %cst_13 = arith.constant dense<0.000000e+00> : vector<16x128xf32>
    %10 = tpu.matmul %0, %9, %cst_13 {dimension_numbers = #tpu.dot_dimension_numbers<[1], [0], [0], [1], [0, 0, 1, 1], [], []>} : vector<16x128xf32>, vector<128x128xf32>, vector<16x128xf32> -> vector<16x128xf32>
    %c0_14 = arith.constant 0 : index
    %c0_15 = arith.constant 0 : index
    %11 = vector.load %arg7[%c0_14, %c0_15] : memref<128x32xf32, #tpu.memory_space<vmem>>, vector<128x32xf32>
    %cst_16 = arith.constant dense<0.000000e+00> : vector<16x32xf32>
    %12 = tpu.matmul %0, %11, %cst_16 {dimension_numbers = #tpu.dot_dimension_numbers<[1], [0], [0], [1], [0, 0, 1, 1], [], []>} : vector<16x128xf32>, vector<128x32xf32>, vector<16x32xf32> -> vector<16x32xf32>
    %c0_17 = arith.constant 0 : index
    %c0_18 = arith.constant 0 : index
    %13 = vector.load %arg8[%c0_17, %c0_18] : memref<32x128xf32, #tpu.memory_space<vmem>>, vector<32x128xf32>
    %cst_19 = arith.constant dense<0.000000e+00> : vector<16x128xf32>
    %14 = tpu.matmul %12, %13, %cst_19 {dimension_numbers = #tpu.dot_dimension_numbers<[1], [0], [0], [1], [0, 0, 1, 1], [], []>} : vector<16x32xf32>, vector<32x128xf32>, vector<16x128xf32> -> vector<16x128xf32>
    %15 = arith.addf %10, %14 : vector<16x128xf32>
    %c0_20 = arith.constant 0 : index
    %c0_21 = arith.constant 0 : index
    %16 = vector.load %arg10[%c0_20, %c0_21] : memref<16x128xf32, #tpu.memory_space<vmem>>, vector<16x128xf32>
    tpu.vector_store %arg10[%c0_20, %c0_21], %15 {strides = array<i32>} : memref<16x128xf32, #tpu.memory_space<vmem>>, vector<16x128xf32>,
    return
  }
  func.func @transform_0(%arg0: i32, %arg1: i32) -> (i32, i32) {
    %c0_i32 = arith.constant 0 : i32
    %c0_i32_0 = arith.constant 0 : i32
    return %arg0, %c0_i32 : i32, i32
  }
  func.func @transform_1(%arg0: i32, %arg1: i32) -> (i32, i32) {
    %c0_i32 = arith.constant 0 : i32
    %c0_i32_0 = arith.constant 0 : i32
    return %c0_i32, %arg1 : i32, i32
  }
  func.func @transform_2(%arg0: i32, %arg1: i32) -> (i32, i32) {
    %c0_i32 = arith.constant 0 : i32
    %c0_i32_0 = arith.constant 0 : i32
    return %c0_i32, %arg1 : i32, i32
  }
  func.func @transform_3(%arg0: i32, %arg1: i32) -> (i32, i32) {
    %c0_i32 = arith.constant 0 : i32
    %c0_i32_0 = arith.constant 0 : i32
    %c0_i32_1 = arith.constant 0 : i32
    return %c0_i32, %c0_i32_0 : i32, i32
  }
  func.func @transform_4(%arg0: i32, %arg1: i32) -> (i32, i32) {
    %c0_i32 = arith.constant 0 : i32
    %c0_i32_0 = arith.constant 0 : i32
    return %c0_i32, %arg1 : i32, i32
  }
  func.func @transform_5(%arg0: i32, %arg1: i32) -> (i32, i32) {
    %c0_i32 = arith.constant 0 : i32
    %c0_i32_0 = arith.constant 0 : i32
    %c0_i32_1 = arith.constant 0 : i32
    return %c0_i32, %c0_i32_0 : i32, i32
  }
  func.func @transform_6(%arg0: i32, %arg1: i32) -> (i32, i32) {
    %c0_i32 = arith.constant 0 : i32
    %c0_i32_0 = arith.constant 0 : i32
    return %c0_i32, %arg1 : i32, i32
  }
  func.func @transform_7(%arg0: i32, %arg1: i32) -> (i32, i32) {
    %c0_i32 = arith.constant 0 : i32
    return %arg0, %arg1 : i32, i32
  }
  func.func @transform_8(%arg0: i32, %arg1: i32) -> (i32, i32) {
    %c0_i32 = arith.constant 0 : i32
    return %arg0, %arg1 : i32, i32
  }
}

</mosaic_0001>

<bundles_post_ra>
// kernel: tpu_custom_call.1
= control target key start
LH: loop header
LB: loop body
LE: loop exit
PB: predicated region body
PF: predicated region fallthrough
CT: control target
= control target key end

     0   :  { %14 = vsyncpa [#allocation3], 0  ;;  %s1549_s0 = inlined_call_operand.hbm [shape: f32[16,128], index: 0, kind: input, shape index: {}]   ;;  %s1550_s1 = inlined_call_operand.hbm [shape: f32[128,128], index: 1, kind: input, shape index: {}]   ;;  %s1551_s2 = inlined_call_operand.hbm [shape: f32[128,128], index: 2, kind: input, shape index: {}]   ;;  %s1552_s3 = inlined_call_operand.hbm [shape: f32[128,32], index: 3, kind: input, shape index: {}]   ;;  %s1553_s4 = inlined_call_operand.hbm [shape: f32[32,128], index: 4, kind: input, shape index: {}]   ;;  %s1554_s5 = inlined_call_operand.hbm [shape: f32[128,32], index: 5, kind: input, shape index: {}]   ;;  %s1555_s6 = inlined_call_operand.hbm [shape: f32[32,128], index: 6, kind: input, shape index: {}]   ;;  %s1556_s7 = inlined_call_operand.hbm [shape: f32[16,128], index: 7, kind: output, shape index: {0}]   ;;  %s1557_s8 = inlined_call_operand.hbm [shape: f32[16,128], index: 8, kind: output, shape index: {1}]  }
   0x1   :  { %15 = vsyncpa [#allocation6], 0 }
   0x2   :  { %16 = vsyncpa [#allocation9], 0 }
   0x3   :  { %17 = vsyncpa [#allocation12], 0 }
   0x4   :  { %18 = vsyncpa [#allocation4], 0 }
   0x5   :  { %19 = vsyncpa [#allocation16], 0  ;;  %s1321_s27 = smov [#allocation5]   ;;  %s1322_s29 = smov [#allocation8]  }
   0x6   :  { %s37_s28 = sshll.u32 %s1321_s27, 4  ;;  %s61_s30 = sshll.u32 %s1322_s29, 4  ;;  %s38_s28 = int_to_ptr.vmem [resolvable:$true] %s37_s28  ;;  %s1377_s30 = int_to_ptr.vmem [resolvable:$true] %s61_s30 }
   0x7   :  { %s1111_s11 = scalar_lea.hbm %s1550_s1, 2048 }
   0x8   :  { %p1112_p0 = scmp.ne.s32.totalorder %s1550_s1, %s1111_s11  ;;  %p1115_p1 = scmp.lt.u32.totalorder %s1111_s11, %s1550_s1 }
   0xa   :  { %p1117_p2 = pnand %p1115_p1, %p1112_p0 }
   0xc   :  { %1120 = shalt.err (!%p1117_p2)
}
   0xd   :  { %s1121_s16 = scalar_lea.vmem %s38_s28, 2048  ;;  %p1126_p4 = scmp.lt.s32.totalorder %s38_s28, %s38_s28 }
   0xe   :  { %p1122_p3 = scmp.ne.s32.totalorder %s38_s28, %s1121_s16  ;;  %p1127_p5 = scmp.lt.s32.totalorder %s1121_s16, %s1121_s16 }
  0x10   :  { %p1128_p6 = por %p1127_p5, %p1126_p4 }
  0x12   :  { %p1129_p7 = pnand %p1128_p6, %p1122_p3 }
  0x14   :  { %1132 = shalt.err (!%p1129_p7)
}
  0x15   :  { %s1323_s17 = smov 128   ;;  %s1324_s18 = smov 8  }
  0x16   :  { %43 = dma.hbm_to_vmem [thread:$0]  %s1550_s1, 2048, %s38_s28, [#allocation6], %s1323_s17, %s1323_s17, %s1324_s18  }
  0x17   :  { %s1133_s23 = scalar_lea.hbm %s1552_s3, 2048 }
  0x18   :  { %p1134_p8 = scmp.ne.s32.totalorder %s1552_s3, %s1133_s23  ;;  %p1137_p9 = scmp.lt.u32.totalorder %s1133_s23, %s1552_s3 }
  0x1a   :  { %p1139_p10 = pnand %p1137_p9, %p1134_p8 }
  0x1c   :  { %1142 = shalt.err (!%p1139_p10)
}
  0x1d   :  { %s1143_s29 = scalar_lea.vmem %s1377_s30, 2048  ;;  %p1148_p12 = scmp.lt.s32.totalorder %s1377_s30, %s1377_s30 }
  0x1e   :  { %p1144_p11 = scmp.ne.s32.totalorder %s1377_s30, %s1143_s29  ;;  %p1149_p13 = scmp.lt.s32.totalorder %s1143_s29, %s1143_s29 }
  0x20   :  { %p1150_p0 = por %p1149_p13, %p1148_p12 }
  0x22   :  { %p1151_p1 = pnand %p1150_p0, %p1144_p11 }
  0x24   :  { %1154 = shalt.err (!%p1151_p1)
}
  0x25   :  { %67 = dma.hbm_to_vmem [thread:$0]  %s1552_s3, 2048, %s1377_s30, [#allocation9], %s1323_s17, %s1323_s17, %s1324_s18  }
  0x26   :  { %s1325_s9 = smov [#allocation11]   ;;  %s1326_s11 = smov [#allocation2]  }
  0x27   :  { %s85_s10 = sshll.u32 %s1325_s9, 4  ;;  %s25_s12 = sshll.u32 %s1326_s11, 4  ;;  %s86_s10 = int_to_ptr.vmem [resolvable:$true] %s85_s10  ;;  %s1414_s12 = int_to_ptr.vmem [resolvable:$true] %s25_s12 }
  0x28   :  { %s1155_s15 = scalar_lea.hbm %s1554_s5, 2048 }
  0x29   :  { %p1156_p2 = scmp.ne.s32.totalorder %s1554_s5, %s1155_s15  ;;  %p1159_p3 = scmp.lt.u32.totalorder %s1155_s15, %s1554_s5 }
  0x2b   :  { %p1161_p4 = pnand %p1159_p3, %p1156_p2 }
  0x2d   :  { %1164 = shalt.err (!%p1161_p4)
}
  0x2e   :  { %s1165_s3 = scalar_lea.vmem %s86_s10, 2048  ;;  %p1170_p6 = scmp.lt.s32.totalorder %s86_s10, %s86_s10 }
  0x2f   :  { %p1166_p5 = scmp.ne.s32.totalorder %s86_s10, %s1165_s3  ;;  %p1171_p7 = scmp.lt.s32.totalorder %s1165_s3, %s1165_s3 }
  0x31   :  { %p1172_p8 = por %p1171_p7, %p1170_p6 }
  0x33   :  { %p1173_p9 = pnand %p1172_p8, %p1166_p5 }
  0x35   :  { %1176 = shalt.err (!%p1173_p9)
}
  0x36   :  { %91 = dma.hbm_to_vmem [thread:$0]  %s1554_s5, 2048, %s86_s10, [#allocation12], %s1323_s17, %s1323_s17, %s1324_s18  }
  0x37   :  { %s1177_s25 = scalar_lea.hbm %s1549_s0, 256 }
  0x38   :  { %p1178_p10 = scmp.ne.s32.totalorder %s1549_s0, %s1177_s25  ;;  %p1181_p11 = scmp.lt.u32.totalorder %s1177_s25, %s1549_s0 }
  0x3a   :  { %p1183_p12 = pnand %p1181_p11, %p1178_p10 }
  0x3c   :  { %1186 = shalt.err (!%p1183_p12)
}
  0x3d   :  { %s1187_s28 = scalar_lea.vmem %s1414_s12, 256  ;;  %p1192_p0 = scmp.lt.s32.totalorder %s1414_s12, %s1414_s12 }
  0x3e   :  { %p1188_p13 = scmp.ne.s32.totalorder %s1414_s12, %s1187_s28  ;;  %p1193_p1 = scmp.lt.s32.totalorder %s1187_s28, %s1187_s28 }
  0x40   :  { %p1194_p2 = por %p1193_p1, %p1192_p0 }
  0x42   :  { %p1195_p3 = pnand %p1194_p2, %p1188_p13 }
  0x44   :  { %1198 = shalt.err (!%p1195_p3)
}
  0x45   :  { %31 = dma.hbm_to_vmem [thread:$0]  %s1549_s0, 256, %s1414_s12, [#allocation3], %s1323_s17, %s1323_s17, %s1324_s18  }
  0x46   :  { %s1327_s10 = smov [#allocation7]   ;;  %s1328_s13 = smov [#allocation10]  }
  0x47   :  { %s49_s11 = sshll.u32 %s1327_s10, 4  ;;  %s73_s14 = sshll.u32 %s1328_s13, 4  ;;  %s50_s11 = int_to_ptr.vmem [resolvable:$true] %s49_s11  ;;  %s1451_s14 = int_to_ptr.vmem [resolvable:$true] %s73_s14 }
  0x48   :  { %s1199_s19 = scalar_lea.hbm %s1551_s2, 2048 }
  0x49   :  { %p1200_p4 = scmp.ne.s32.totalorder %s1551_s2, %s1199_s19  ;;  %p1203_p5 = scmp.lt.u32.totalorder %s1199_s19, %s1551_s2 }
  0x4b   :  { %p1205_p6 = pnand %p1203_p5, %p1200_p4 }
  0x4d   :  { %1208 = shalt.err (!%p1205_p6)
}
  0x4e   :  { %s1209_s0 = scalar_lea.vmem %s50_s11, 2048  ;;  %p1214_p8 = scmp.lt.s32.totalorder %s50_s11, %s50_s11 }
  0x4f   :  { %p1210_p7 = scmp.ne.s32.totalorder %s50_s11, %s1209_s0  ;;  %p1215_p9 = scmp.lt.s32.totalorder %s1209_s0, %s1209_s0 }
  0x51   :  { %p1216_p10 = por %p1215_p9, %p1214_p8 }
  0x53   :  { %p1217_p11 = pnand %p1216_p10, %p1210_p7 }
  0x55   :  { %1220 = shalt.err (!%p1217_p11)
}
  0x56   :  { %55 = dma.hbm_to_vmem [thread:$0]  %s1551_s2, 2048, %s50_s11, [#allocation6], %s1323_s17, %s1323_s17, %s1324_s18  }
  0x57   :  { %s1221_s25 = scalar_lea.hbm %s1553_s4, 512 }
  0x58   :  { %p1222_p12 = scmp.ne.s32.totalorder %s1553_s4, %s1221_s25  ;;  %p1225_p13 = scmp.lt.u32.totalorder %s1221_s25, %s1553_s4 }
  0x5a   :  { %p1227_p0 = pnand %p1225_p13, %p1222_p12 }
  0x5c   :  { %1230 = shalt.err (!%p1227_p0)
}
  0x5d   :  { %s1231_s28 = scalar_lea.vmem %s1451_s14, 512  ;;  %p1236_p2 = scmp.lt.s32.totalorder %s1451_s14, %s1451_s14 }
  0x5e   :  { %p1232_p1 = scmp.ne.s32.totalorder %s1451_s14, %s1231_s28  ;;  %p1237_p3 = scmp.lt.s32.totalorder %s1231_s28, %s1231_s28 }
  0x60   :  { %p1238_p4 = por %p1237_p3, %p1236_p2 }
  0x62   :  { %p1239_p5 = pnand %p1238_p4, %p1232_p1 }
  0x64   :  { %1242 = shalt.err (!%p1239_p5)
}
  0x65   :  { %79 = dma.hbm_to_vmem [thread:$0]  %s1553_s4, 512, %s1451_s14, [#allocation9], %s1323_s17, %s1323_s17, %s1324_s18  }
  0x66   :  { %s1329_s9 = smov [#allocation13]   ;;  %s1243_s15 = scalar_lea.hbm %s1555_s6, 512 }
  0x67   :  { %s97_s10 = sshll.u32 %s1329_s9, 4  ;;  %p1244_p6 = scmp.ne.s32.totalorder %s1555_s6, %s1243_s15  ;;  %s98_s10 = int_to_ptr.vmem [resolvable:$true] %s97_s10 }
  0x68   :  { %p1247_p7 = scmp.lt.u32.totalorder %s1243_s15, %s1555_s6 }
  0x6a   :  { %p1249_p8 = pnand %p1247_p7, %p1244_p6 }
  0x6c   :  { %1252 = shalt.err (!%p1249_p8)
}
  0x6d   :  { %s1253_s3 = scalar_lea.vmem %s98_s10, 512  ;;  %p1258_p10 = scmp.lt.s32.totalorder %s98_s10, %s98_s10 }
  0x6e   :  { %p1254_p9 = scmp.ne.s32.totalorder %s98_s10, %s1253_s3  ;;  %p1259_p11 = scmp.lt.s32.totalorder %s1253_s3, %s1253_s3 }
  0x70   :  { %p1260_p12 = por %p1259_p11, %p1258_p10 }
  0x72   :  { %p1261_p13 = pnand %p1260_p12, %p1254_p9 }
  0x74   :  { %1264 = shalt.err (!%p1261_p13)
}
  0x75   :  { %103 = dma.hbm_to_vmem [thread:$0]  %s1555_s6, 512, %s98_s10, [#allocation12], %s1323_s17, %s1323_s17, %s1324_s18  }
  0x76   :  { %1309 = dma.done.wait [#allocation3], 256  }
  0x77   :  { %1310 = vsyncadd [#allocation3], 4294967040 }
  0x78   :  { %1311 = dma.done.wait [#allocation6], 4096  }
  0x79   :  { %1312 = vsyncadd [#allocation6], 4294963200 }
  0x7a   :  { %1313 = dma.done.wait [#allocation9], 2560  }
  0x7b   :  { %1314 = vsyncadd [#allocation9], 4294964736 }
  0x7c   :  { %1315 = dma.done.wait [#allocation12], 2560  }
  0x7d   :  { %1316 = vsyncadd [#allocation12], 4294964736  ;;  %v143_v0 = vld [vmem:[#allocation8] sm:$0xff]  ;;  %v144_v1 = vld [vmem:[#allocation8 + $0x8] sm:$0xff]  ;;  %vm238_vm0 = vcmask 261120   ;;  %s1330_s6 = smov [#allocation14]  }
  0x7e   :  { %v145_v2 = vld [vmem:[#allocation8 + $0x10] sm:$0xff]  ;;  %v952_v3 = vpack.c.bf16 %v144_v1, %v143_v0  ;;  %v146_v4 = vld [vmem:[#allocation8 + $0x18] sm:$0xff]  ;;  %v147_v6 = vld [vmem:[#allocation8 + $0x20] sm:$0xff]  ;;  %s671_s30 = sshll.u32 %s1330_s6, 4  ;;  %s672_s30 = int_to_ptr.vmem [resolvable:$true] %s671_s30 }
  0x7f   :  { %v956_v5 = vpack.c.bf16 %v146_v4, %v145_v2  ;;  %v148_v7 = vld [vmem:[#allocation8 + $0x28] sm:$0xff]  ;;  %v149_v9 = vld [vmem:[#allocation8 + $0x30] sm:$0xff]  ;;  %v150_v10 = vld [vmem:[#allocation8 + $0x38] sm:$0xff]  ;;  %s1265_s0 = scalar_lea.vmem %s672_s30, 256  ;;  %p1270_p1 = scmp.lt.s32.totalorder %s672_s30, %s672_s30 }
  0x80   :  { %953 = vmatprep.subr.bf16.mxu0 %v952_v3  ;;  %v960_v8 = vpack.c.bf16 %v148_v7, %v147_v6  ;;  %v1503_v11 = vld [vmem:[#allocation2] sm:$0xff]  ;;  %v127_v12 = vld [vmem:[#allocation5] sm:$0xff]  ;;  %v128_v13 = vld [vmem:[#allocation5 + $0x8] sm:$0xff]  ;;  %v964_v20 = vpack.c.bf16 %v150_v10, %v149_v9  ;;  %p1266_p0 = scmp.ne.s32.totalorder %s672_s30, %s1265_s0  ;;  %p1271_p2 = scmp.lt.s32.totalorder %s1265_s0, %s1265_s0 }
  0x81   :  { %955 = vmatpush3.bf16.msra.mxu0 %v952_v3  ;;  %822 = vmatprep.mubr.f32.mxu0 %v1503_v11  ;;  %v129_v14 = vld [vmem:[#allocation5 + $0x10] sm:$0xff]  ;;  %v992_v15 = vpack.c.bf16 %v128_v13, %v127_v12  ;;  %v130_v16 = vld [vmem:[#allocation5 + $0x18] sm:$0xff]  ;;  %v131_v18 = vld [vmem:[#allocation5 + $0x20] sm:$0xff] }
  0x82   :  { %957 = vmatprep.subr.bf16.mxu0 %v956_v5  ;;  %868 = vmatprep.mubr.f32.mxu1 %v1503_v11  ;;  %v996_v17 = vpack.c.bf16 %v130_v16, %v129_v14  ;;  %v132_v19 = vld [vmem:[#allocation5 + $0x28] sm:$0xff]  ;;  %v151_v21 = vld [vmem:[#allocation8 + $0x40] sm:$0xff]  ;;  %v133_v24 = vld [vmem:[#allocation5 + $0x30] sm:$0xff]  ;;  %p1272_p3 = por %p1271_p2, %p1270_p1 }
  0x83   :  { %993 = vmatprep.subr.bf16.mxu1 %v992_v15  ;;  %v152_v22 = vld [vmem:[#allocation8 + $0x48] sm:$0xff]  ;;  %v1000_v23 = vpack.c.bf16 %v132_v19, %v131_v18  ;;  %v134_v25 = vld [vmem:[#allocation5 + $0x38] sm:$0xff]  ;;  %v153_v27 = vld [vmem:[#allocation8 + $0x50] sm:$0xff] }
  0x84   :  { %995 = vmatpush3.bf16.msra.mxu1 %v992_v15  ;;  %v968_v26 = vpack.c.bf16 %v152_v22, %v151_v21  ;;  %v154_v28 = vld [vmem:[#allocation8 + $0x58] sm:$0xff]  ;;  %v1004_v29 = vpack.c.bf16 %v134_v25, %v133_v24  ;;  %v135_v30 = vld [vmem:[#allocation5 + $0x40] sm:$0xff]  ;;  %v136_v31 = vld [vmem:[#allocation5 + $0x48] sm:$0xff]  ;;  %p1273_p4 = pnand %p1272_p3, %p1266_p0 }
  0x85   :  { %959 = vmatpush3.bf16.msra.mxu0 %v956_v5  ;;  %997 = vmatprep.subr.bf16.mxu1 %v996_v17  ;;  %v972_v32 = vpack.c.bf16 %v154_v28, %v153_v27  ;;  %v155_v33 = vld [vmem:[#allocation8 + $0x60] sm:$0xff]  ;;  %v156_v34 = vld [vmem:[#allocation8 + $0x68] sm:$0xff]  ;;  %v1008_v35 = vpack.c.bf16 %v136_v31, %v135_v30  ;;  %v137_v36 = vld [vmem:[#allocation5 + $0x50] sm:$0xff] }
  0x86   :  { %961 = vmatprep.subr.bf16.mxu0 %v960_v8  ;;  %v138_v37 = vld [vmem:[#allocation5 + $0x58] sm:$0xff]  ;;  %v976_v38 = vpack.c.bf16 %v156_v34, %v155_v33  ;;  %v157_v39 = vld [vmem:[#allocation8 + $0x70] sm:$0xff]  ;;  %v139_v42 = vld [vmem:[#allocation5 + $0x60] sm:$0xff] }
  0x87   :  { %v158_v40 = vld [vmem:[#allocation8 + $0x78] sm:$0xff]  ;;  %v1012_v41 = vpack.c.bf16 %v138_v37, %v137_v36  ;;  %v140_v43 = vld [vmem:[#allocation5 + $0x68] sm:$0xff]  ;;  %v234_v45 = vld [vmem:[#allocation10] sm:$0xff] }
  0x88   :  { %999 = vmatpush3.bf16.msra.mxu1 %v996_v17  ;;  %v980_v44 = vpack.c.bf16 %v158_v40, %v157_v39  ;;  %v235_v46 = vld [vmem:[#allocation10 + $0x8] sm:$0xff]  ;;  %v1016_v47 = vpack.c.bf16 %v140_v43, %v139_v42  ;;  %v141_v48 = vld [vmem:[#allocation5 + $0x70] sm:$0xff]  ;;  %v142_v49 = vld [vmem:[#allocation5 + $0x78] sm:$0xff] }
  0x89   :  { %963 = vmatpush3.bf16.msra.mxu0 %v960_v8  ;;  %1001 = vmatprep.subr.bf16.mxu1 %v1000_v23  ;;  %v984_v50 = vpack.c.bf16 %v235_v46, %v234_v45  ;;  %v236_v51 = vld [vmem:[#allocation10 + $0x10] sm:$0xff]  ;;  %v237_v52 = vld [vmem:[#allocation10 + $0x18] sm:$0xff]  ;;  %v1020_v53 = vpack.c.bf16 %v142_v49, %v141_v48  ;;  %v413_v56 = vld [vmem:[#allocation11] sm:$0xff] }
  0x8a   :  { %965 = vmatprep.subr.bf16.mxu0 %v964_v20  ;;  %v1507_v54 = vld [vmem:[#allocation2 + $0x8] sm:$0xff]  ;;  %v988_v55 = vpack.c.bf16 %v237_v52, %v236_v51  ;;  %v414_v57 = vld [vmem:[#allocation11 + $0x8] sm:$0xff]  ;;  %v415_v59 = vld [vmem:[#allocation11 + $0x10] sm:$0xff] }
  0x8b   :  { %v1024_v58 = vpack.c.bf16 %v414_v57, %v413_v56  ;;  %v416_v60 = vld [vmem:[#allocation11 + $0x18] sm:$0xff]  ;;  %v417_v0 = vld [vmem:[#allocation11 + $0x20] sm:$0xff]  ;;  %v418_v1 = vld [vmem:[#allocation11 + $0x28] sm:$0xff] }
  0x8c   :  { %1003 = vmatpush3.bf16.msra.mxu1 %v1000_v23  ;;  %v1028_v63 = vpack.c.bf16 %v416_v60, %v415_v59  ;;  %v1032_v2 = vpack.c.bf16 %v418_v1, %v417_v0  ;;  %v419_v3 = vld [vmem:[#allocation11 + $0x30] sm:$0xff]  ;;  %v420_v4 = vld [vmem:[#allocation11 + $0x38] sm:$0xff]  ;;  %v421_v6 = vld [vmem:[#allocation11 + $0x40] sm:$0xff] }
  0x8d   :  { %967 = vmatpush3.bf16.msra.mxu0 %v964_v20  ;;  %1005 = vmatprep.subr.bf16.mxu1 %v1004_v29  ;;  %v1036_v5 = vpack.c.bf16 %v420_v4, %v419_v3  ;;  %v422_v7 = vld [vmem:[#allocation11 + $0x48] sm:$0xff]  ;;  %v423_v9 = vld [vmem:[#allocation11 + $0x50] sm:$0xff]  ;;  %v424_v10 = vld [vmem:[#allocation11 + $0x58] sm:$0xff] }
  0x8e   :  { %969 = vmatprep.subr.bf16.mxu0 %v968_v26  ;;  %v1040_v8 = vpack.c.bf16 %v422_v7, %v421_v6  ;;  %v1044_v12 = vpack.c.bf16 %v424_v10, %v423_v9  ;;  %v425_v13 = vld [vmem:[#allocation11 + $0x60] sm:$0xff]  ;;  %v426_v14 = vld [vmem:[#allocation11 + $0x68] sm:$0xff]  ;;  %v427_v16 = vld [vmem:[#allocation11 + $0x70] sm:$0xff] }
  0x8f   :  { %v1048_v15 = vpack.c.bf16 %v426_v14, %v425_v13  ;;  %v428_v17 = vld [vmem:[#allocation11 + $0x78] sm:$0xff]  ;;  %v504_v21 = vld [vmem:[#allocation13] sm:$0xff]  ;;  %v505_v22 = vld [vmem:[#allocation13 + $0x8] sm:$0xff] }
  0x90   :  { %1007 = vmatpush3.bf16.msra.mxu1 %v1004_v29  ;;  %v1052_v18 = vpack.c.bf16 %v428_v17, %v427_v16  ;;  %v506_v23 = vld [vmem:[#allocation13 + $0x10] sm:$0xff]  ;;  %v1056_v24 = vpack.c.bf16 %v505_v22, %v504_v21  ;;  %v507_v25 = vld [vmem:[#allocation13 + $0x18] sm:$0xff]  ;;  %v397_v27 = vld [vmem:[#allocation7] sm:$0xff] }
  0x91   :  { %971 = vmatpush3.bf16.msra.mxu0 %v968_v26  ;;  %1009 = vmatprep.subr.bf16.mxu1 %v1008_v35  ;;  %v1060_v26 = vpack.c.bf16 %v507_v25, %v506_v23  ;;  %v398_v28 = vld [vmem:[#allocation7 + $0x8] sm:$0xff]  ;;  %v399_v34 = vld [vmem:[#allocation7 + $0x10] sm:$0xff]  ;;  %v401_v39 = vld [vmem:[#allocation7 + $0x20] sm:$0xff] }
  0x92   :  { %973 = vmatprep.subr.bf16.mxu0 %v972_v32  ;;  %v1064_v29 = vpack.c.bf16 %v398_v28, %v397_v27  ;;  %v402_v40 = vld [vmem:[#allocation7 + $0x28] sm:$0xff]  ;;  %v403_v42 = vld [vmem:[#allocation7 + $0x30] sm:$0xff]  ;;  %v404_v43 = vld [vmem:[#allocation7 + $0x38] sm:$0xff] }
  0x93   :  { %v405_v45 = vld [vmem:[#allocation7 + $0x40] sm:$0xff]  ;;  %v406_v46 = vld [vmem:[#allocation7 + $0x48] sm:$0xff]  ;;  %v407_v48 = vld [vmem:[#allocation7 + $0x50] sm:$0xff] }
  0x94   :  { %1011 = vmatpush3.bf16.msra.mxu1 %v1008_v35  ;;  %v400_v35 = vld [vmem:[#allocation7 + $0x18] sm:$0xff]  ;;  %v409_v51 = vld [vmem:[#allocation7 + $0x60] sm:$0xff]  ;;  %v410_v52 = vld [vmem:[#allocation7 + $0x68] sm:$0xff] }
  0x95   :  { %975 = vmatpush3.bf16.msra.mxu0 %v972_v32  ;;  %1013 = vmatprep.subr.bf16.mxu1 %v1012_v41  ;;  %v408_v49 = vld [vmem:[#allocation7 + $0x58] sm:$0xff] }
  0x96   :  { %977 = vmatprep.subr.bf16.mxu0 %v976_v38 }
  0x98   :  { %1015 = vmatpush3.bf16.msra.mxu1 %v1012_v41  ;;  %v1072_v41 = vpack.c.bf16 %v402_v40, %v401_v39 }
  0x99   :  { %979 = vmatpush3.bf16.msra.mxu0 %v976_v38  ;;  %1017 = vmatprep.subr.bf16.mxu1 %v1016_v47  ;;  %v1068_v38 = vpack.c.bf16 %v400_v35, %v399_v34 }
  0x9a   :  { %981 = vmatprep.subr.bf16.mxu0 %v980_v44 }
  0x9c   :  { %1019 = vmatpush3.bf16.msra.mxu1 %v1016_v47  ;;  %v1080_v47 = vpack.c.bf16 %v406_v46, %v405_v45 }
  0x9d   :  { %983 = vmatpush3.bf16.msra.mxu0 %v980_v44  ;;  %1021 = vmatprep.subr.bf16.mxu1 %v1020_v53  ;;  %v1076_v44 = vpack.c.bf16 %v404_v43, %v403_v42 }
  0x9e   :  { %985 = vmatprep.subr.bf16.mxu0 %v984_v50 }
  0xa0   :  { %823 = vmatmul.mubr.f32.vlgmr.msra.gmra.mrb[0].mxu0 %v1507_v54  ;;  %1023 = vmatpush3.bf16.msra.mxu1 %v1020_v53  ;;  %v411_v53 = vld [vmem:[#allocation7 + $0x70] sm:$0xff] }
  0xa1   :  { %987 = vmatpush3.bf16.msra.mxu0 %v984_v50  ;;  %1057 = vmatprep.subr.bf16.mxu1 %v1056_v24  ;;  %v1084_v50 = vpack.c.bf16 %v408_v49, %v407_v48 }
  0xa2   :  { %989 = vmatprep.subr.bf16.mxu0 %v988_v55 }
  0xa3   :  { %869 = vmatmul.mubr.f32.vlgmr.msra.gmra.mrb[0].mxu1 %v1507_v54 }
  0xa4   :  { %1059 = vmatpush3.bf16.msra.mxu1 %v1056_v24 }
  0xa5   :  { %991 = vmatpush3.bf16.msra.mxu0 %v988_v55  ;;  %1061 = vmatprep.subr.bf16.mxu1 %v1060_v26  ;;  %v412_v55 = vld [vmem:[#allocation7 + $0x78] sm:$0xff] }
  0xa6   :  { %1025 = vmatprep.subr.bf16.mxu0 %v1024_v58  ;;  %v1092_v56 = vpack.c.bf16 %v412_v55, %v411_v53 }
  0xa8   :  { %1063 = vmatpush3.bf16.msra.mxu1 %v1060_v26 }
  0xa9   :  { %1065 = vmatprep.subr.bf16.mxu1 %v1064_v29 }
 0x173   :  { %v824_v61 = vpop.f32.mrb[0].mxu0 }
 0x174   :  { %v225_v62 = vpop.f32.mrb[1].mxu0 }
 0x175   :  { %833 = vmatprep.mubr.msk.f32.mxu0 %vm238_vm0, %v225_v62 }
 0x176   :  { %834 = vmatmul.mubr.msk.f32.vlgmr.msra.gmra.mrb[2].mxu0 %vm238_vm0, %v824_v61  ;;  %v870_v19 = vpop.f32.mrb[0].mxu1 }
 0x177   :  { %1027 = vmatpush3.bf16.msra.mxu0 %v1024_v58  ;;  %903 = vmatprep.mubr.f32.mxu0 %v1503_v11  ;;  %v386_v20 = vpop.f32.mrb[1].mxu1 }
 0x178   :  { %1029 = vmatprep.subr.bf16.mxu0 %v1028_v63 }
 0x17b   :  { %1031 = vmatpush3.bf16.msra.mxu0 %v1028_v63 }
 0x17c   :  { %1033 = vmatprep.subr.bf16.mxu0 %v1032_v2 }
 0x17f   :  { %1035 = vmatpush3.bf16.msra.mxu0 %v1032_v2 }
 0x180   :  { %1037 = vmatprep.subr.bf16.mxu0 %v1036_v5 }
 0x183   :  { %1039 = vmatpush3.bf16.msra.mxu0 %v1036_v5 }
 0x184   :  { %1041 = vmatprep.subr.bf16.mxu0 %v1040_v8 }
 0x187   :  { %1043 = vmatpush3.bf16.msra.mxu0 %v1040_v8 }
 0x188   :  { %1045 = vmatprep.subr.bf16.mxu0 %v1044_v12 }
 0x18b   :  { %1047 = vmatpush3.bf16.msra.mxu0 %v1044_v12 }
 0x18c   :  { %1049 = vmatprep.subr.bf16.mxu0 %v1048_v15 }
 0x18f   :  { %1051 = vmatpush3.bf16.msra.mxu0 %v1048_v15 }
 0x190   :  { %1053 = vmatprep.subr.bf16.mxu0 %v1052_v18 }
 0x193   :  { %1055 = vmatpush3.bf16.msra.mxu0 %v1052_v18 }
 0x196   :  { %904 = vmatmul.mubr.f32.vlgmr.msra.gmra.mrb[4].mxu0 %v1507_v54 }
 0x249   :  { %v835_v30 = vpop.f32.mrb[2].mxu0 }
 0x24a   :  { %v392_v31 = vadd.f32 %v870_v19, %v835_v30  ;;  %v311_v32 = vpop.f32.mrb[3].mxu0 }
 0x24b   :  { %v387_v33 = vadd.f32 %v386_v20, %v311_v32 }
 0x24c   :  { %396 = vst [vmem:[#allocation14 + $0x8] sm:$0xff] %v392_v31 }
 0x24d   :  { %395 = vst [vmem:[#allocation14] sm:$0xff] %v387_v33 }
 0x269   :  { %v905_v36 = vpop.f32.mrb[4].mxu0 }
 0x26a   :  { %v495_v37 = vpop.f32.mrb[5].mxu0 }
 0x26b   :  { %914 = vmatprep.mubr.msk.f32.mxu1 %vm238_vm0, %v495_v37 }
 0x26c   :  { %915 = vmatmul.mubr.msk.f32.vlgmr.msra.gmra.mrb[2].mxu1 %vm238_vm0, %v905_v36 }
 0x26d   :  { %1067 = vmatpush3.bf16.msra.mxu1 %v1064_v29  ;;  %949 = vmatprep.mubr.f32.mxu1 %v1503_v11  ;;  %v1088_v11 = vpack.c.bf16 %v410_v52, %v409_v51 }
 0x26e   :  { %1069 = vmatprep.subr.bf16.mxu1 %v1068_v38 }
 0x271   :  { %1071 = vmatpush3.bf16.msra.mxu1 %v1068_v38 }
 0x272   :  { %1073 = vmatprep.subr.bf16.mxu1 %v1072_v41 }
 0x275   :  { %1075 = vmatpush3.bf16.msra.mxu1 %v1072_v41 }
 0x276   :  { %1077 = vmatprep.subr.bf16.mxu1 %v1076_v44 }
 0x279   :  { %1079 = vmatpush3.bf16.msra.mxu1 %v1076_v44 }
 0x27a   :  { %1081 = vmatprep.subr.bf16.mxu1 %v1080_v47 }
 0x27d   :  { %1083 = vmatpush3.bf16.msra.mxu1 %v1080_v47 }
 0x27e   :  { %1085 = vmatprep.subr.bf16.mxu1 %v1084_v50 }
 0x281   :  { %1087 = vmatpush3.bf16.msra.mxu1 %v1084_v50 }
 0x282   :  { %1089 = vmatprep.subr.bf16.mxu1 %v1088_v11 }
 0x285   :  { %1091 = vmatpush3.bf16.msra.mxu1 %v1088_v11 }
 0x286   :  { %1093 = vmatprep.subr.bf16.mxu1 %v1092_v56 }
 0x289   :  { %1095 = vmatpush3.bf16.msra.mxu1 %v1092_v56 }
 0x28c   :  { %950 = vmatmul.mubr.f32.vlgmr.msra.gmra.mrb[2].mxu1 %v1507_v54 }
 0x28d   :  { %1276 = shalt.err (!%p1273_p4)
}
 0x28e   :  { %s1277_s23 = scalar_lea.hbm %s1556_s7, 256 }
 0x28f   :  { %p1278_p5 = scmp.ne.s32.totalorder %s1556_s7, %s1277_s23  ;;  %p1281_p6 = scmp.lt.u32.totalorder %s1277_s23, %s1556_s7 }
 0x291   :  { %p1283_p7 = pnand %p1281_p6, %p1278_p5 }
 0x293   :  { %1286 = shalt.err (!%p1283_p7)
}
 0x294   :  { %677 = dma.vmem_to_hbm [thread:$0]  %s672_s30, 256, %s1556_s7, [#allocation4], %s1323_s17, %s1323_s17, %s1324_s18  }
 0x295   :  { %s1331_s28 = smov [#allocation15]  }
 0x296   :  { %s683_s2 = sshll.u32 %s1331_s28, 4  ;;  %s684_s2 = int_to_ptr.vmem [resolvable:$true] %s683_s2 }
 0x297   :  { %s1287_s5 = scalar_lea.vmem %s684_s2, 256  ;;  %p1292_p9 = scmp.lt.s32.totalorder %s684_s2, %s684_s2 }
 0x298   :  { %p1288_p8 = scmp.ne.s32.totalorder %s684_s2, %s1287_s5  ;;  %p1293_p10 = scmp.lt.s32.totalorder %s1287_s5, %s1287_s5 }
 0x29a   :  { %p1294_p11 = por %p1293_p10, %p1292_p9 }
 0x29c   :  { %p1295_p12 = pnand %p1294_p11, %p1288_p8 }
 0x35f   :  { %v951_v54 = vpop.f32.mrb[2].mxu1 }
 0x360   :  { %665 = vst [vmem:[#allocation15 + $0x8] sm:$0xff] %v951_v54  ;;  %v655_v57 = vpop.f32.mrb[3].mxu1 }
 0x361   :  { %664 = vst [vmem:[#allocation15] sm:$0xff] %v655_v57 }
 0x362   :  { %1298 = shalt.err (!%p1295_p12)
}
 0x363   :  { %s1299_s11 = scalar_lea.hbm %s1557_s8, 256 }
 0x364   :  { %p1300_p13 = scmp.ne.s32.totalorder %s1557_s8, %s1299_s11  ;;  %p1303_p0 = scmp.lt.u32.totalorder %s1299_s11, %s1557_s8 }
 0x366   :  { %p1305_p1 = pnand %p1303_p0, %p1300_p13 }
 0x368   :  { %1308 = shalt.err (!%p1305_p1)
}
 0x369   :  { %689 = dma.vmem_to_hbm [thread:$0]  %s684_s2, 256, %s1557_s8, [#allocation16], %s1323_s17, %s1323_s17, %s1324_s18  }
 0x36a   :  { %1317 = dma.done.wait [#allocation4], 256  }
 0x36b   :  { %1318 = vsyncadd [#allocation4], 4294967040 }
 0x36c   :  { %1319 = dma.done.wait [#allocation16], 256  }
 0x36d   :  { %1320 = vsyncadd [#allocation16], 4294967040 }
 0x36e   :  { %696 = vsyncpa [#allocation3], 1 }
 0x36f   :  { %697 = vsyncpa [#allocation6], 1 }
 0x370   :  { %698 = vsyncpa [#allocation9], 1 }
 0x371   :  { %699 = vsyncpa [#allocation12], 1 }
 0x372   :  { %700 = vsyncpa [#allocation4], 1 }
 0x373   :  { %701 = vsyncpa [#allocation16], 1 }

</bundles_post_ra>
